<compile_context>
chip_gen: v5e
topology: v5e:2x2
jax: 0.10.0
libtpu: 0.0.40
codegen_flags: <defaults>
</compile_context>

<pallas_src>
import functools

import jax
import jax.numpy as jnp
from jax.experimental import pallas as pl
from jax.experimental.pallas import tpu as pltpu


def _saliency_att_kernel(bu_ref, sal_ref, h1_ref,
                         wf_ref, bf_ref,      # att_feat        (F -> A), bf16 fast path
                         wd_ref, bd_ref,      # att_decoder     (D -> A)
                         ws_ref, bs_ref,      # weight_saliency (S -> F)
                         wsa_ref, bsa_ref,    # att_saliency    (F -> A)
                         wa_ref, ba_ref,      # att             (A -> 1), wa pre-shaped (1, A)
                         out_ref, *, n_regions):
    f32 = jnp.float32
    TBN, F = bu_ref.shape
    N = n_regions
    TB = TBN // N
    A = wf_ref.shape[1]

    bu_flat = bu_ref[...]                                   # (TB*N, F), bf16 in the fast path
    sal = sal_ref[...]                                      # (TB, S)
    h1 = h1_ref[...]                                        # (TB, D)

    # --- dense projections (MXU). The image projection runs directly on the flat
    # (TB*N, F) slab delivered by the wrapper; only the small f32 result is re-viewed
    # as (TB, N, A), a pure leading-dim split (layout no-op when N % 8 == 0). ---
    img_att = (jnp.dot(bu_flat, wf_ref[...], preferred_element_type=f32)
               + bf_ref[...]).reshape(TB, N, A)                                      # (TB, N, A)
    h1_att = jnp.dot(h1, wd_ref[...], preferred_element_type=f32) + bd_ref[...]      # (TB, A)
    sal_w = jnp.dot(sal, ws_ref[...], preferred_element_type=f32) + bs_ref[...]      # (TB, F)
    sal_att = jnp.dot(sal_w, wsa_ref[...], preferred_element_type=f32) + bsa_ref[...]  # (TB, A)

    # --- relu branches (dropout = identity in eval mode) ---
    att1 = jnp.maximum(h1_att[:, None, :] + img_att, 0.0)                            # (TB, N, A)
    s_att1 = jnp.maximum(sal_att + h1_att, 0.0)                                      # (TB, A)

    # --- `att` (A -> 1) as VPU multiply + lane reduce; fused logits, no concat ---
    wa = wa_ref[...]                                                                  # (1, A)
    logits_img = jnp.sum(att1 * wa.reshape(1, 1, A), axis=-1) + ba_ref[...]           # (TB, N)
    logits_s = jnp.sum(s_att1 * wa, axis=-1, keepdims=True) + ba_ref[...]             # (TB, 1)

    # --- softmax over the N+1 logits; the divide goes to the EUP via approx rcp ---
    m = jnp.maximum(jnp.max(logits_img, axis=-1, keepdims=True), logits_s)            # (TB, 1)
    e_img = jnp.exp(logits_img - m)                                                   # (TB, N)
    e_s = jnp.exp(logits_s - m)                                                       # (TB, 1)
    inv = pl.reciprocal(jnp.sum(e_img, axis=-1, keepdims=True) + e_s, approx=True)    # (TB, 1)
    sig_img = e_img * inv                                                             # (TB, N)
    sig_s = e_s * inv                                                                 # (TB, 1)

    # --- weighted sums. bu is upcast BEFORE the leading-dim split so the reshape is
    # (8,128)-sublane-aligned (free for N % 8 == 0); the N-reduction is a sublane
    # reduce on the XLU. ---
    bu3 = bu_flat.astype(f32).reshape(TB, N, F)                                       # (TB, N, F)
    aw = jnp.sum(bu3 * sig_img[:, :, None], axis=1) + sal_w * sig_s                   # (TB, F)
    out_ref[...] = aw.astype(out_ref.dtype)


def _pick_batch_tile(B, N, F, itemsize):
    """Batch tile heuristic: multiple of 8, divides B, ~4 MiB of BU bytes per grid
    step, and >=2 grid steps when possible (v7x shards a 'parallel' axis over its
    2 TensorCores; on v5e/v6e only the tile size matters)."""
    if B <= 8 or B % 8 != 0:
        return B
    target_rows = max(8, (4 << 20) // max(1, N * F * itemsize))
    cap = min(target_rows, B // 2)
    tb = 8
    for cand in range(8, cap + 1, 8):
        if B % cand == 0:
            tb = cand
    return tb


def _padded_bytes(shape, dtype):
    """Lane/sublane-padded VMEM tile size estimate for a (..., rows, cols) block."""
    itemsize = jnp.dtype(dtype).itemsize
    shape = tuple(shape)
    if len(shape) < 2:
        shape = (1,) * (2 - len(shape)) + shape
    *lead, r, c = shape
    sub = max(8, 32 // itemsize)             # 8 for f32, 16 for bf16 (sublane packing)
    rows = -(-r // sub) * sub
    cols = -(-c // 128) * 128
    lead_n = 1
    for d in lead:
        lead_n *= d
    return lead_n * rows * cols * itemsize


def saliency_att_forward(BU_feats, saliency_feats, h1, params, *,
                         batch_tile=None, use_bf16=True,
                         input_buffer_count=None, weight_buffer_count=None,
                         vmem_limit_bytes=None):
    B, N, F = BU_feats.shape
    S = saliency_feats.shape[1]
    D = h1.shape[1]
    A = params["w_feat"].shape[1]

    bu_dtype = jnp.bfloat16 if use_bf16 else jnp.float32
    # Free HBM reinterpretation: flatten (B, N, F) -> (B*N, F) so the big projection
    # runs as a single dense MXU matmul with M = TB*N per grid step.
    bu_flat = BU_feats.reshape(B * N, F).astype(bu_dtype)
    w_feat = params["w_feat"].astype(bu_dtype)
    wa_row = params["w_att"].reshape(1, A)           # (A, 1) -> (1, A), free host-side reshape

    itemsize = jnp.dtype(bu_dtype).itemsize
    TB = _pick_batch_tile(B, N, F, itemsize) if batch_tile is None else batch_tile
    assert B % TB == 0, "batch must be divisible by the batch tile"
    assert TB == B or TB % 8 == 0, "batch tile must equal B or be a multiple of 8"
    if TB != B and use_bf16:
        assert (TB * N) % 16 == 0, "bf16 BU tile needs (TB*N) divisible by 16 (sublane packing)"
    num_tiles = B // TB

    # Explicit scoped-VMEM budget: double-buffered IO + weights + headroom for the
    # f32 intermediates (img_att / att1 / bu3 are (TB*N, <=128) f32 slabs).
    if vmem_limit_bytes is None:
        step_io = (_padded_bytes((TB * N, F), bu_dtype)
                   + _padded_bytes((TB, S), jnp.float32)
                   + _padded_bytes((TB, D), jnp.float32)
                   + _padded_bytes((TB, F), jnp.float32))
        w_bytes = (_padded_bytes((F, A), bu_dtype)
                   + _padded_bytes((D, A), jnp.float32)
                   + _padded_bytes((S, F), jnp.float32)
                   + _padded_bytes((F, A), jnp.float32)
                   + 5 * _padded_bytes((1, max(A, F)), jnp.float32))
        interm = 8 * _padded_bytes((TB * N, max(F, A)), jnp.float32)
        vmem_limit_bytes = int(min(64 << 20,
                                   max(16 << 20,
                                       2 * step_io + 2 * w_bytes + interm + (2 << 20))))

    def _tiled(shape, buffer_count):
        nd = len(shape)
        imap = lambda b, _nd=nd: (b,) + (0,) * (_nd - 1)
        if buffer_count is None:
            return pl.BlockSpec(shape, imap)
        return pl.BlockSpec(shape, imap, pipeline_mode=pl.Buffered(buffer_count))

    def _const(shape, buffer_count):
        nd = len(shape)
        imap = lambda b, _nd=nd: (0,) * _nd
        if buffer_count is None:
            return pl.BlockSpec(shape, imap)
        # e.g. weight_buffer_count=1 on v7x when F/A are large, to avoid spending
        # VMEM on double-buffering grid-invariant weights.
        return pl.BlockSpec(shape, imap, pipeline_mode=pl.Buffered(buffer_count))

    kernel = functools.partial(_saliency_att_kernel, n_regions=N)

    out = pl.pallas_call(
        kernel,
        out_shape=jax.ShapeDtypeStruct((B, F), jnp.float32),
        grid_spec=pltpu.PrefetchScalarGridSpec(
            num_scalar_prefetch=0,
            grid=(num_tiles,),
            in_specs=[
                _tiled((TB * N, F), input_buffer_count),     # BU_feats, flat & (maybe) bf16
                _tiled((TB, S), input_buffer_count),         # saliency_feats
                _tiled((TB, D), input_buffer_count),         # h1
                _const((F, A), weight_buffer_count), _const((1, A), weight_buffer_count),  # att_feat
                _const((D, A), weight_buffer_count), _const((1, A), weight_buffer_count),  # att_decoder
                _const((S, F), weight_buffer_count), _const((1, F), weight_buffer_count),  # weight_saliency
                _const((F, A), weight_buffer_count), _const((1, A), weight_buffer_count),  # att_saliency
                _const((1, A), weight_buffer_count), _const((1, 1), weight_buffer_count),  # att (row) + bias
            ],
            out_specs=pl.BlockSpec((TB, F), lambda b: (b, 0)),
        ),
        compiler_params=pltpu.CompilerParams(
            dimension_semantics=("parallel",),
            vmem_limit_bytes=vmem_limit_bytes),
    )(bu_flat, saliency_feats, h1,
      w_feat, params["b_feat"],
      params["w_dec"], params["b_dec"],
      params["w_sal"], params["b_sal"],
      params["w_satt"], params["b_satt"],
      wa_row, params["b_att"])
    return out


def _weight_norm_linear(key, in_dim, out_dim):
    """Deterministic weight_norm'd Linear params; returns W as (in, out), b as (1, out)."""
    kv, kg, kb = jax.random.split(key, 3)
    v = jax.random.normal(kv, (out_dim, in_dim), jnp.float32) * 0.1
    g = 1.0 + 0.1 * jax.random.normal(kg, (out_dim,), jnp.float32)
    b = 0.1 * jax.random.normal(kb, (out_dim,), jnp.float32)
    w = g[:, None] * v / jnp.linalg.norm(v, axis=1, keepdims=True)   # (out, in)
    return w.T, b.reshape(1, out_dim)


def make_params(key, featureSize, saliencySize, decodeSize, attSize):
    ks = jax.random.split(key, 5)
    w_feat, b_feat = _weight_norm_linear(ks[0], featureSize, attSize)
    w_dec, b_dec = _weight_norm_linear(ks[1], decodeSize, attSize)
    w_sal, b_sal = _weight_norm_linear(ks[2], saliencySize, featureSize)
    w_satt, b_satt = _weight_norm_linear(ks[3], featureSize, attSize)
    w_att, b_att = _weight_norm_linear(ks[4], attSize, 1)
    return dict(w_feat=w_feat, b_feat=b_feat, w_dec=w_dec, b_dec=b_dec,
                w_sal=w_sal, b_sal=b_sal, w_satt=w_satt, b_satt=b_satt,
                w_att=w_att, b_att=b_att)


def reference_forward(BU_feats, saliency_feats, h1, p):
    """Pure-JAX mirror of the PyTorch forward (dropout = identity)."""
    h1_att = h1 @ p["w_dec"] + p["b_dec"]                        # (B, A)
    img_att = BU_feats @ p["w_feat"] + p["b_feat"]               # (B, N, A)
    sal_w = saliency_feats @ p["w_sal"] + p["b_sal"]             # (B, F)
    sal_att = sal_w @ p["w_satt"] + p["b_satt"]                  # (B, A)
    att1 = jax.nn.relu(h1_att[:, None, :] + img_att)             # (B, N, A)
    att2 = att1 @ p["w_att"] + p["b_att"]                        # (B, N, 1)
    attention_img = att2[..., 0]                                 # (B, N)
    s_att1 = jax.nn.relu(sal_att + h1_att)                       # (B, A)
    s_att = s_att1 @ p["w_att"] + p["b_att"]                     # (B, 1)
    attention = jnp.concatenate([attention_img, s_att], axis=1)  # (B, N+1)
    sig = jax.nn.softmax(attention, axis=1)
    aw_sal = sal_w * sig[:, -1:]                                 # (B, F)
    aw_img = jnp.sum(BU_feats * sig[:, :-1, None], axis=1) + aw_sal
    return aw_img


if __name__ == "__main__":
    featureSize, saliencySize, decodeSize, attSize = 32, 16, 32, 32

    key = jax.random.PRNGKey(0)
    kp = jax.random.split(key, 2)[0]
    params = make_params(kp, featureSize, saliencySize, decodeSize, attSize)

    def run_and_check(B, N, seed, batch_tile=None):
        kk1, kk2, kk3 = jax.random.split(jax.random.PRNGKey(seed), 3)
        BU = jax.random.normal(kk1, (B, N, featureSize), jnp.float32)
        sal = jax.random.normal(kk2, (B, saliencySize), jnp.float32)
        h1 = jax.random.normal(kk3, (B, decodeSize), jnp.float32)

        out = saliency_att_forward(BU, sal, h1, params, batch_tile=batch_tile)
        out = jax.block_until_ready(out)

        # Reference on the same bf16-rounded operands the kernel's fast path sees
        # (remaining deltas: f32-accum bf16 matmul, EUP exp, approx reciprocal).
        BU_r = BU.astype(jnp.bfloat16).astype(jnp.float32)
        p_r = dict(params)
        p_r["w_feat"] = params["w_feat"].astype(jnp.bfloat16).astype(jnp.float32)
        ref = reference_forward(BU_r, sal, h1, p_r)

        assert out.shape == (B, featureSize)
        assert jnp.allclose(out, ref, atol=1e-2, rtol=1e-2), f"mismatch vs reference (B={B})"

    # Small case: whole batch in a single grid step.
    run_and_check(B=2, N=8, seed=1)
    # Batch-tiled case: heuristic picks TB=128 -> grid=(2,) on the parallel axis
    # (both v7x TensorCores busy), bf16 BU slab DMA'd per step.
    run_and_check(B=256, N=8, seed=2)

    print("KERNEL_OK")
</pallas_src>

<mosaic_0001>
module attributes {stable_mosaic.version = 11 : i64} {
  func.func @_saliency_att_kernel(%arg0: i32, %arg1: memref<16x32xbf16, #tpu.memory_space<vmem>>, %arg2: memref<2x16xf32, #tpu.memory_space<vmem>>, %arg3: memref<2x32xf32, #tpu.memory_space<vmem>>, %arg4: memref<32x32xbf16, #tpu.memory_space<vmem>>, %arg5: memref<1x32xf32, #tpu.memory_space<vmem>>, %arg6: memref<32x32xf32, #tpu.memory_space<vmem>>, %arg7: memref<1x32xf32, #tpu.memory_space<vmem>>, %arg8: memref<16x32xf32, #tpu.memory_space<vmem>>, %arg9: memref<1x32xf32, #tpu.memory_space<vmem>>, %arg10: memref<32x32xf32, #tpu.memory_space<vmem>>, %arg11: memref<1x32xf32, #tpu.memory_space<vmem>>, %arg12: memref<1x32xf32, #tpu.memory_space<vmem>>, %arg13: memref<1x1xf32, #tpu.memory_space<vmem>>, %arg14: memref<2x32xf32, #tpu.memory_space<vmem>>) attributes {dimension_semantics = [#tpu.dimension_semantics<parallel>], iteration_bounds = array<i64: 1>, scalar_prefetch = 0 : i64, scratch_operands = 0 : i64, tpu.core_type = #tpu.core_type<tc>, window_params = [{transform_indices = @transform_0, window_bounds = array<i64: 16, 32>}, {transform_indices = @transform_1, window_bounds = array<i64: 2, 16>}, {transform_indices = @transform_2, window_bounds = array<i64: 2, 32>}, {pipeline_mode = #tpu.pipeline_mode<synchronous>, transform_indices = @transform_3, window_bounds = array<i64: 32, 32>}, {pipeline_mode = #tpu.pipeline_mode<synchronous>, transform_indices = @transform_4, window_bounds = array<i64: 1, 32>}, {pipeline_mode = #tpu.pipeline_mode<synchronous>, transform_indices = @transform_5, window_bounds = array<i64: 32, 32>}, {pipeline_mode = #tpu.pipeline_mode<synchronous>, transform_indices = @transform_6, window_bounds = array<i64: 1, 32>}, {pipeline_mode = #tpu.pipeline_mode<synchronous>, transform_indices = @transform_7, window_bounds = array<i64: 16, 32>}, {pipeline_mode = #tpu.pipeline_mode<synchronous>, transform_indices = @transform_8, window_bounds = array<i64: 1, 32>}, {pipeline_mode = #tpu.pipeline_mode<synchronous>, transform_indices = @transform_9, window_bounds = array<i64: 32, 32>}, {pipeline_mode = #tpu.pipeline_mode<synchronous>, transform_indices = @transform_10, window_bounds = array<i64: 1, 32>}, {pipeline_mode = #tpu.pipeline_mode<synchronous>, transform_indices = @transform_11, window_bounds = array<i64: 1, 32>}, {pipeline_mode = #tpu.pipeline_mode<synchronous>, transform_indices = @transform_12, window_bounds = array<i64: 1, 1>}, {transform_indices = @transform_13, window_bounds = array<i64: 2, 32>}]} {
    %c0 = arith.constant 0 : index
    %c0_0 = arith.constant 0 : index
    %0 = vector.load %arg1[%c0, %c0_0] : memref<16x32xbf16, #tpu.memory_space<vmem>>, vector<16x32xbf16>
    %c0_1 = arith.constant 0 : index
    %c0_2 = arith.constant 0 : index
    %1 = vector.load %arg2[%c0_1, %c0_2] : memref<2x16xf32, #tpu.memory_space<vmem>>, vector<2x16xf32>
    %c0_3 = arith.constant 0 : index
    %c0_4 = arith.constant 0 : index
    %2 = vector.load %arg3[%c0_3, %c0_4] : memref<2x32xf32, #tpu.memory_space<vmem>>, vector<2x32xf32>
    %c0_5 = arith.constant 0 : index
    %c0_6 = arith.constant 0 : index
    %3 = vector.load %arg4[%c0_5, %c0_6] : memref<32x32xbf16, #tpu.memory_space<vmem>>, vector<32x32xbf16>
    %cst = arith.constant dense<0.000000e+00> : vector<16x32xf32>
    %4 = tpu.matmul %0, %3, %cst {dimension_numbers = #tpu.dot_dimension_numbers<[1], [0], [0], [1], [0, 0, 1, 1], [], []>} : vector<16x32xbf16>, vector<32x32xbf16>, vector<16x32xf32> -> vector<16x32xf32>
    %c0_7 = arith.constant 0 : index
    %c0_8 = arith.constant 0 : index
    %5 = vector.load %arg5[%c0_7, %c0_8] : memref<1x32xf32, #tpu.memory_space<vmem>>, vector<1x32xf32>
    %6 = vector.broadcast %5 : vector<1x32xf32> to vector<16x32xf32>
    %7 = arith.addf %4, %6 : vector<16x32xf32>
    %8 = vector.shape_cast %7 : vector<16x32xf32> to vector<2x8x32xf32>
    %c0_9 = arith.constant 0 : index
    %c0_10 = arith.constant 0 : index
    %9 = vector.load %arg6[%c0_9, %c0_10] : memref<32x32xf32, #tpu.memory_space<vmem>>, vector<32x32xf32>
    %cst_11 = arith.constant dense<0.000000e+00> : vector<2x32xf32>
    %10 = tpu.matmul %2, %9, %cst_11 {dimension_numbers = #tpu.dot_dimension_numbers<[1], [0], [0], [1], [0, 0, 1, 1], [], []>} : vector<2x32xf32>, vector<32x32xf32>, vector<2x32xf32> -> vector<2x32xf32>
    %c0_12 = arith.constant 0 : index
    %c0_13 = arith.constant 0 : index
    %11 = vector.load %arg7[%c0_12, %c0_13] : memref<1x32xf32, #tpu.memory_space<vmem>>, vector<1x32xf32>
    %12 = vector.broadcast %11 : vector<1x32xf32> to vector<2x32xf32>
    %13 = arith.addf %10, %12 : vector<2x32xf32>
    %c0_14 = arith.constant 0 : index
    %c0_15 = arith.constant 0 : index
    %14 = vector.load %arg8[%c0_14, %c0_15] : memref<16x32xf32, #tpu.memory_space<vmem>>, vector<16x32xf32>
    %cst_16 = arith.constant dense<0.000000e+00> : vector<2x32xf32>
    %15 = tpu.matmul %1, %14, %cst_16 {dimension_numbers = #tpu.dot_dimension_numbers<[1], [0], [0], [1], [0, 0, 1, 1], [], []>} : vector<2x16xf32>, vector<16x32xf32>, vector<2x32xf32> -> vector<2x32xf32>
    %c0_17 = arith.constant 0 : index
    %c0_18 = arith.constant 0 : index
    %16 = vector.load %arg9[%c0_17, %c0_18] : memref<1x32xf32, #tpu.memory_space<vmem>>, vector<1x32xf32>
    %17 = vector.broadcast %16 : vector<1x32xf32> to vector<2x32xf32>
    %18 = arith.addf %15, %17 : vector<2x32xf32>
    %c0_19 = arith.constant 0 : index
    %c0_20 = arith.constant 0 : index
    %19 = vector.load %arg10[%c0_19, %c0_20] : memref<32x32xf32, #tpu.memory_space<vmem>>, vector<32x32xf32>
    %cst_21 = arith.constant dense<0.000000e+00> : vector<2x32xf32>
    %20 = tpu.matmul %18, %19, %cst_21 {dimension_numbers = #tpu.dot_dimension_numbers<[1], [0], [0], [1], [0, 0, 1, 1], [], []>} : vector<2x32xf32>, vector<32x32xf32>, vector<2x32xf32> -> vector<2x32xf32>
    %c0_22 = arith.constant 0 : index
    %c0_23 = arith.constant 0 : index
    %21 = vector.load %arg11[%c0_22, %c0_23] : memref<1x32xf32, #tpu.memory_space<vmem>>, vector<1x32xf32>
    %22 = vector.broadcast %21 : vector<1x32xf32> to vector<2x32xf32>
    %23 = arith.addf %20, %22 : vector<2x32xf32>
    %24 = vector.shape_cast %13 : vector<2x32xf32> to vector<2x1x32xf32>
    %25 = vector.broadcast %24 : vector<2x1x32xf32> to vector<2x8x32xf32>
    %26 = arith.addf %25, %8 : vector<2x8x32xf32>
    %cst_24 = arith.constant 0.000000e+00 : f32
    %27 = vector.broadcast %cst_24 : f32 to vector<2x8x32xf32>
    %28 = arith.maximumf %26, %27 : vector<2x8x32xf32>
    %29 = arith.addf %23, %13 : vector<2x32xf32>
    %cst_25 = arith.constant 0.000000e+00 : f32
    %30 = vector.broadcast %cst_25 : f32 to vector<2x32xf32>
    %31 = arith.maximumf %29, %30 : vector<2x32xf32>
    %c0_26 = arith.constant 0 : index
    %c0_27 = arith.constant 0 : index
    %32 = vector.load %arg12[%c0_26, %c0_27] : memref<1x32xf32, #tpu.memory_space<vmem>>, vector<1x32xf32>
    %33 = vector.shape_cast %32 : vector<1x32xf32> to vector<1x1x32xf32>
    %34 = vector.broadcast %33 : vector<1x1x32xf32> to vector<2x8x32xf32>
    %35 = arith.mulf %28, %34 : vector<2x8x32xf32>
    %cst_28 = arith.constant dense<0.000000e+00> : vector<2x8xf32>
    %36 = vector.multi_reduction <add>, %35, %cst_28 [2] : vector<2x8x32xf32> to vector<2x8xf32>
    %c0_29 = arith.constant 0 : index
    %c0_30 = arith.constant 0 : index
    %37 = vector.load %arg13[%c0_29, %c0_30] : memref<1x1xf32, #tpu.memory_space<vmem>>, vector<1x1xf32>
    %38 = vector.broadcast %37 : vector<1x1xf32> to vector<2x8xf32>
    %39 = arith.addf %36, %38 : vector<2x8xf32>
    %40 = vector.broadcast %32 : vector<1x32xf32> to vector<2x32xf32>
    %41 = arith.mulf %31, %40 : vector<2x32xf32>
    %cst_31 = arith.constant dense<0.000000e+00> : vector<2xf32>
    %42 = vector.multi_reduction <add>, %41, %cst_31 [1] : vector<2x32xf32> to vector<2xf32>
    %43 = vector.shape_cast %42 : vector<2xf32> to vector<2x1xf32>
    %c0_32 = arith.constant 0 : index
    %c0_33 = arith.constant 0 : index
    %44 = vector.load %arg13[%c0_32, %c0_33] : memref<1x1xf32, #tpu.memory_space<vmem>>, vector<1x1xf32>
    %45 = vector.broadcast %44 : vector<1x1xf32> to vector<2x1xf32>
    %46 = arith.addf %43, %45 : vector<2x1xf32>
    %cst_34 = arith.constant dense<0xFF800000> : vector<2xf32>
    %47 = vector.multi_reduction <maximumf>, %39, %cst_34 [1] : vector<2x8xf32> to vector<2xf32>
    %48 = vector.shape_cast %47 : vector<2xf32> to vector<2x1xf32>
    %49 = arith.maximumf %48, %46 : vector<2x1xf32>
    %50 = vector.broadcast %49 : vector<2x1xf32> to vector<2x8xf32>
    %51 = arith.subf %39, %50 : vector<2x8xf32>
    %52 = math.exp %51 : vector<2x8xf32>
    %53 = arith.subf %46, %49 : vector<2x1xf32>
    %54 = math.exp %53 : vector<2x1xf32>
    %cst_35 = arith.constant dense<0.000000e+00> : vector<2xf32>
    %55 = vector.multi_reduction <add>, %52, %cst_35 [1] : vector<2x8xf32> to vector<2xf32>
    %56 = vector.shape_cast %55 : vector<2xf32> to vector<2x1xf32>
    %57 = arith.addf %56, %54 : vector<2x1xf32>
    %58 = tpu.reciprocal %57 {approx = true} : vector<2x1xf32> -> vector<2x1xf32>
    %59 = vector.broadcast %58 : vector<2x1xf32> to vector<2x8xf32>
    %60 = arith.mulf %52, %59 : vector<2x8xf32>
    %61 = arith.mulf %54, %58 : vector<2x1xf32>
    %62 = arith.extf %0 : vector<16x32xbf16> to vector<16x32xf32>
    %63 = vector.shape_cast %62 : vector<16x32xf32> to vector<2x8x32xf32>
    %64 = vector.shape_cast %60 : vector<2x8xf32> to vector<2x8x1xf32>
    %65 = vector.broadcast %64 : vector<2x8x1xf32> to vector<2x8x32xf32>
    %66 = arith.mulf %63, %65 : vector<2x8x32xf32>
    %cst_36 = arith.constant dense<0.000000e+00> : vector<2x32xf32>
    %67 = vector.multi_reduction <add>, %66, %cst_36 [1] : vector<2x8x32xf32> to vector<2x32xf32>
    %68 = vector.broadcast %61 : vector<2x1xf32> to vector<2x32xf32>
    %69 = arith.mulf %18, %68 : vector<2x32xf32>
    %70 = arith.addf %67, %69 : vector<2x32xf32>
    %c0_37 = arith.constant 0 : index
    %c0_38 = arith.constant 0 : index
    %71 = vector.load %arg14[%c0_37, %c0_38] : memref<2x32xf32, #tpu.memory_space<vmem>>, vector<2x32xf32>
    tpu.vector_store %arg14[%c0_37, %c0_38], %70 {strides = array<i32>} : memref<2x32xf32, #tpu.memory_space<vmem>>, vector<2x32xf32>,
    return
  }
  func.func @transform_0(%arg0: i32) -> (i32, i32) {
    %c0_i32 = arith.constant 0 : i32
    %c0_i32_0 = arith.constant 0 : i32
    return %arg0, %c0_i32 : i32, i32
  }
  func.func @transform_1(%arg0: i32) -> (i32, i32) {
    %c0_i32 = arith.constant 0 : i32
    %c0_i32_0 = arith.constant 0 : i32
    return %arg0, %c0_i32 : i32, i32
  }
  func.func @transform_2(%arg0: i32) -> (i32, i32) {
    %c0_i32 = arith.constant 0 : i32
    %c0_i32_0 = arith.constant 0 : i32
    return %arg0, %c0_i32 : i32, i32
  }
  func.func @transform_3(%arg0: i32) -> (i32, i32) {
    %c0_i32 = arith.constant 0 : i32
    %c0_i32_0 = arith.constant 0 : i32
    %c0_i32_1 = arith.constant 0 : i32
    return %c0_i32, %c0_i32_0 : i32, i32
  }
  func.func @transform_4(%arg0: i32) -> (i32, i32) {
    %c0_i32 = arith.constant 0 : i32
    %c0_i32_0 = arith.constant 0 : i32
    %c0_i32_1 = arith.constant 0 : i32
    return %c0_i32, %c0_i32_0 : i32, i32
  }
  func.func @transform_5(%arg0: i32) -> (i32, i32) {
    %c0_i32 = arith.constant 0 : i32
    %c0_i32_0 = arith.constant 0 : i32
    %c0_i32_1 = arith.constant 0 : i32
    return %c0_i32, %c0_i32_0 : i32, i32
  }
  func.func @transform_6(%arg0: i32) -> (i32, i32) {
    %c0_i32 = arith.constant 0 : i32
    %c0_i32_0 = arith.constant 0 : i32
    %c0_i32_1 = arith.constant 0 : i32
    return %c0_i32, %c0_i32_0 : i32, i32
  }
  func.func @transform_7(%arg0: i32) -> (i32, i32) {
    %c0_i32 = arith.constant 0 : i32
    %c0_i32_0 = arith.constant 0 : i32
    %c0_i32_1 = arith.constant 0 : i32
    return %c0_i32, %c0_i32_0 : i32, i32
  }
  func.func @transform_8(%arg0: i32) -> (i32, i32) {
    %c0_i32 = arith.constant 0 : i32
    %c0_i32_0 = arith.constant 0 : i32
    %c0_i32_1 = arith.constant 0 : i32
    return %c0_i32, %c0_i32_0 : i32, i32
  }
  func.func @transform_9(%arg0: i32) -> (i32, i32) {
    %c0_i32 = arith.constant 0 : i32
    %c0_i32_0 = arith.constant 0 : i32
    %c0_i32_1 = arith.constant 0 : i32
    return %c0_i32, %c0_i32_0 : i32, i32
  }
  func.func @transform_10(%arg0: i32) -> (i32, i32) {
    %c0_i32 = arith.constant 0 : i32
    %c0_i32_0 = arith.constant 0 : i32
    %c0_i32_1 = arith.constant 0 : i32
    return %c0_i32, %c0_i32_0 : i32, i32
  }
  func.func @transform_11(%arg0: i32) -> (i32, i32) {
    %c0_i32 = arith.constant 0 : i32
    %c0_i32_0 = arith.constant 0 : i32
    %c0_i32_1 = arith.constant 0 : i32
    return %c0_i32, %c0_i32_0 : i32, i32
  }
  func.func @transform_12(%arg0: i32) -> (i32, i32) {
    %c0_i32 = arith.constant 0 : i32
    %c0_i32_0 = arith.constant 0 : i32
    %c0_i32_1 = arith.constant 0 : i32
    return %c0_i32, %c0_i32_0 : i32, i32
  }
  func.func @transform_13(%arg0: i32) -> (i32, i32) {
    %c0_i32 = arith.constant 0 : i32
    %c0_i32_0 = arith.constant 0 : i32
    return %arg0, %c0_i32 : i32, i32
  }
}

</mosaic_0001>

<bundles_post_ra>
// kernel: tpu_custom_call.1
= control target key start
LH: loop header
LB: loop body
LE: loop exit
PB: predicated region body
PF: predicated region fallthrough
CT: control target
= control target key end

     0   :  { %s821_s0 = inlined_call_operand.hbm [shape: bf16[16,32], index: 0, kind: input, shape index: {}]   ;;  %s822_s1 = inlined_call_operand.vmem [shape: f32[2,16], index: 1, kind: input, shape index: {}]   ;;  %s823_s2 = inlined_call_operand.hbm [shape: f32[2,32], index: 2, kind: input, shape index: {}]   ;;  %s824_s3 = inlined_call_operand.hbm [shape: bf16[32,32], index: 3, kind: input, shape index: {}]   ;;  %s825_s4 = inlined_call_operand.vmem [shape: f32[1,32], index: 4, kind: input, shape index: {}]   ;;  %s826_s5 = inlined_call_operand.hbm [shape: f32[32,32], index: 5, kind: input, shape index: {}]   ;;  %s827_s6 = inlined_call_operand.vmem [shape: f32[1,32], index: 6, kind: input, shape index: {}]   ;;  %s828_s7 = inlined_call_operand.hbm [shape: f32[16,32], index: 7, kind: input, shape index: {}]   ;;  %s829_s8 = inlined_call_operand.vmem [shape: f32[1,32], index: 8, kind: input, shape index: {}]   ;;  %s830_s9 = inlined_call_operand.hbm [shape: f32[32,32], index: 9, kind: input, shape index: {}]   ;;  %s831_s10 = inlined_call_operand.vmem [shape: f32[1,32], index: 10, kind: input, shape index: {}]   ;;  %s832_s11 = inlined_call_operand.vmem [shape: f32[1,32], index: 11, kind: input, shape index: {}]   ;;  %s833_s12 = inlined_call_operand.<no memory space> [shape: f32[1,1], index: 12, kind: input, shape index: {}]   ;;  %s834_s13 = inlined_call_operand.hbm [shape: f32[2,32], index: 13, kind: output, shape index: {}]  }
   0x1   :  { %v18_v0 = vstv %s833_s12 }
   0x2   :  { %19 = vst [vmem:[#allocation2] sm:$0x1] %v18_v0 }
   0x3   :  { %20 = vsyncpa [#allocation4], 0 }
   0x4   :  { %21 = vsyncpa [#allocation7], 0 }
   0x5   :  { %22 = vsyncpa [#allocation10], 0 }
   0x6   :  { %23 = vsyncpa [#allocation13], 0  ;;  %s45_s29 = sshll.u32 %s823_s2, 4  ;;  %s46_s29 = int_to_ptr.hbm [resolvable:$true] %s45_s29 }
   0x7   :  { %24 = vsyncpa [#allocation5], 0  ;;  %s670_s30 = smov [#allocation6]   ;;  %s70_s17 = sshll.u32 %s826_s5, 4  ;;  %s71_s17 = int_to_ptr.hbm [resolvable:$true] %s70_s17 }
   0x8   :  { %s47_s14 = sshll.u32 %s670_s30, 4  ;;  %s671_s12 = smov [#allocation9]   ;;  %s48_s14 = int_to_ptr.vmem [resolvable:$true] %s47_s14 }
   0x9   :  { %50 = dma.hbm_to_vmem [thread:$0]  %s46_s29, 32, %s48_s14, [#allocation7]  }
   0xa   :  { %s72_s18 = sshll.u32 %s671_s12, 4  ;;  %s672_s19 = smov 128   ;;  %s73_s18 = int_to_ptr.vmem [resolvable:$true] %s72_s18 }
   0xb   :  { %s673_s20 = smov 8   ;;  %s29_s22 = sshll.u32 %s821_s0, 4  ;;  %s30_s22 = int_to_ptr.hbm [resolvable:$true] %s29_s22 }
   0xc   :  { %78 = dma.hbm_to_vmem [thread:$0]  %s71_s17, 512, %s73_s18, [#allocation10], %s672_s19, %s672_s19, %s673_s20  }
   0xd   :  { %s674_s23 = smov [#allocation3]   ;;  %s55_s26 = sshll.u32 %s824_s3, 4  ;;  %s56_s26 = int_to_ptr.hbm [resolvable:$true] %s55_s26 }
   0xe   :  { %s31_s24 = sshll.u32 %s674_s23, 4  ;;  %s675_s27 = smov 64   ;;  %s32_s24 = int_to_ptr.vmem [resolvable:$true] %s31_s24 }
   0xf   :  { %s676_s28 = smov 4   ;;  %s677_s29 = smov [#allocation8]  }
  0x10   :  { %37 = dma.hbm_to_vmem [thread:$0]  %s30_s22, 128, %s32_s24, [#allocation4], %s675_s27, %s675_s27, %s676_s28  }
  0x11   :  { %s57_s30 = sshll.u32 %s677_s29, 4  ;;  %s85_s16 = sshll.u32 %s828_s7, 4  ;;  %s58_s30 = int_to_ptr.vmem [resolvable:$true] %s57_s30  ;;  %s86_s16 = int_to_ptr.hbm [resolvable:$true] %s85_s16 }
  0x12   :  { %63 = dma.hbm_to_vmem [thread:$0]  %s56_s26, 256, %s58_s30, [#allocation7], %s675_s27, %s675_s27, %s676_s28  }
  0x13   :  { %s100_s12 = sshll.u32 %s830_s9, 4  ;;  %s678_s18 = smov [#allocation11]   ;;  %s101_s12 = int_to_ptr.hbm [resolvable:$true] %s100_s12 }
  0x14   :  { %s87_s2 = sshll.u32 %s678_s18, 4  ;;  %s679_s3 = smov [#allocation12]   ;;  %s88_s2 = int_to_ptr.vmem [resolvable:$true] %s87_s2 }
  0x15   :  { %93 = dma.hbm_to_vmem [thread:$0]  %s86_s16, 256, %s88_s2, [#allocation10], %s672_s19, %s672_s19, %s673_s20  }
  0x16   :  { %s102_s21 = sshll.u32 %s679_s3, 4  ;;  %s103_s21 = int_to_ptr.vmem [resolvable:$true] %s102_s21 }
  0x17   :  { %108 = dma.hbm_to_vmem [thread:$0]  %s101_s12, 512, %s103_s21, [#allocation13], %s672_s19, %s672_s19, %s673_s20  }
  0x18   :  { %660 = dma.done.wait [#allocation4], 128  }
  0x19   :  { %661 = vsyncadd [#allocation4], 4294967168 }
  0x1a   :  { %662 = dma.done.wait [#allocation7], 288  }
  0x1b   :  { %663 = vsyncadd [#allocation7], 4294967008 }
  0x1c   :  { %664 = dma.done.wait [#allocation10], 768  }
  0x1d   :  { %665 = vsyncadd [#allocation10], 4294966528 }
  0x1e   :  { %666 = dma.done.wait [#allocation13], 512  }
  0x1f   :  { %667 = vsyncadd [#allocation13], 4294966784  ;;  %v190_v1 = vld [vmem:[#allocation9 + $0x18] sm:$0xff]  ;;  %v219_v2 = vld [vmem:[#allocation11 + $0x8] sm:$0xff]  ;;  %vm224_vm0 = vcmask 130048   ;;  %vm169_vm1 = vcmask 261120   ;;  %v321_v42 = vlaneseq }
  0x20   :  { %v462_v3 = vld [vmem:[#allocation8 + $0x8] sm:$0xff]  ;;  %210 = vmatpush.msra.mxu1 %v190_v1  ;;  %242 = vmatpush.msra.mxu2 %v219_v2  ;;  %v189_v4 = vld [vmem:[#allocation9 + $0x10] sm:$0xff]  ;;  %v218_v5 = vld [vmem:[#allocation11] sm:$0xff]  ;;  %v680_v17 = vmov 0   ;;  %vm325_vm2 = vcmask 1041409   ;;  %vm328_vm3 = vcmask 58368  }
  0x21   :  { %v142_v6 = vld [vmem:[%s822_s1] sm:$0x3]  ;;  %179 = vmatpush.bf16.msra.mxu0 %v462_v3  ;;  %v188_v7 = vld [vmem:[#allocation9 + $0x8] sm:$0xff]  ;;  %v461_v8 = vld [vmem:[#allocation8] sm:$0xff]  ;;  %475 = vset.pattern.permute.xlu1 %v680_v17  ;;  %v322_v45 = vand.u32 127, %v321_v42  ;;  %vm313_vm4 = vcmask 254976  }
  0x22   :  { %211 = vmatpush.msra.mxu1 %v189_v4  ;;  %243 = vmatpush.msra.mxu2 %v218_v5  ;;  %v187_v9 = vld [vmem:[#allocation9] sm:$0xff]  ;;  %v143_v10 = vld [vmem:[#allocation6] sm:$0x3]  ;;  %v249_v14 = vld [vmem:[#allocation12 + $0x8] sm:$0xff]  ;;  %s431_s27 = sshll.u32 %s834_s13, 4  ;;  %s432_s27 = int_to_ptr.hbm [resolvable:$true] %s431_s27 }
  0x23   :  { %v251_v11 = vld [vmem:[#allocation12 + $0x18] sm:$0xff]  ;;  %458 = vmatmul.msk.f32.vlgmr.msra.gmra.mxu2 %vm224_vm0, %v142_v6  ;;  %v250_v13 = vld [vmem:[#allocation12 + $0x10] sm:$0xff]  ;;  %v248_v15 = vld [vmem:[#allocation12] sm:$0xff]  ;;  %476 = vset.pattern.permute.xlu2 %v680_v17 }
  0x24   :  { %v460_v12 = vld [vmem:[#allocation3] sm:$0xff]  ;;  %271 = vmatpush.msra.mxu3 %v251_v11  ;;  %212 = vmatpush.msra.mxu1 %v188_v7  ;;  %v482_v16 = vld [vmem:[#allocation2] ss:$0 sm:$0xff] }
  0x25   :  { %180 = vmatpush.bf16.msra.mxu0 %v461_v8  ;;  %307 = vperm.xlu1 %475, %v482_v16   ;;  %v478_v18 = vld [vmem:[%s827_s6] ss:$0 sm:$0xff] }
  0x26   :  { %213 = vmatpush.msra.mxu1 %v187_v9  ;;  %272 = vmatpush.msra.mxu3 %v250_v13  ;;  %v479_v19 = vld [vmem:[%s825_s4] ss:$0 sm:$0xff] }
  0x27   :  { %457 = vmatmul.msk.f32.vlgmr.msra.gmra.mxu1 %vm169_vm1, %v143_v10  ;;  %477 = vset.pattern.permute.xlu0 %v680_v17  ;;  %v480_v20 = vld [vmem:[%s829_s8] ss:$0 sm:$0xff] }
  0x28   :  { %456 = vmatmul.msk.bf16.vlgmr.msra.gmra.mxu0 %vm169_vm1, %v460_v12  ;;  %273 = vmatpush.msra.mxu3 %v249_v14  ;;  %v481_v30 = vld [vmem:[%s832_s11] ss:$0 sm:$0xff] }
  0x29   :  { %v483_v44 = vld [vmem:[%s831_s10] ss:$0 sm:$0xff]  ;;  %s681_s10 = smov [#allocation14]  }
  0x2a   :  { %274 = vmatpush.msra.mxu3 %v248_v15  ;;  %s429_s11 = sshll.u32 %s681_s10, 4  ;;  %s430_s11 = int_to_ptr.vmem [resolvable:$true] %s429_s11 }
  0x97   :  { %v308_v43 = vpop.permute.xlu1 %307 }
  0xa4   :  { %v215_v21 = vpop.f32.mrf.mxu1 }
  0xa5   :  { %v216_v22 = vadd.f32 %v478_v18, %v215_v21  ;;  %v182_v23 = vpop.f32.mrf.mxu0 }
  0xa6   :  { %v183_v24 = vadd.f32 %v479_v19, %v182_v23  ;;  %v245_v25 = vpop.f32.mrf.mxu2 }
  0xa7   :  { %v281_v26 = vperm.slane %v216_v22, 0  ;;  %v796_v27 = vadd.f32 %v480_v20, %v245_v25  ;;  %v280_v28 = vrot.slane %v216_v22, 1 }
  0xa9   :  { %v285_v29 = vadd.f32 %v281_v26, %v183_v24  ;;  %459 = vmatmul.msk.f32.vlgmr.msra.gmra.mxu3 %vm169_vm1, %v796_v27  ;;  %v282_v32 = vperm.slane %v280_v28, 0  ;;  %v141_v26 = vld [vmem:[#allocation3] sm:$0xff]  }
  0xaa   :  { %v379_v28 = vunpack.c.h.bf16 %v141_v26 }
  0xab   :  { %v287_v31 = vmax.f32 %v285_v29, 0.0 }
  0xad   :  { %v184_v33 = vpop.f32.mrf.mxu0  ;;  %v295_v34 = vmul.f32 %v481_v30, %v287_v31 }
  0xae   :  { %v185_v35 = vadd.f32 %v479_v19, %v184_v33  ;;  %v378_v33 = vunpack.c.l.bf16 %v141_v26 }
  0xaf   :  { %v297_v36 = vsel %vm169_vm1, %v295_v34, 0.0 }
  0xb0   :  { %v286_v37 = vadd.f32 %v282_v32, %v185_v35  ;;  %298 = vadd.xlane.f32.xlu0 %v297_v36 }
  0xb2   :  { %v288_v38 = vmax.f32 %v286_v37, 0.0 }
  0xb4   :  { %v296_v39 = vmul.f32 %v481_v30, %v288_v38 }
  0xb6   :  { %v300_v40 = vsel %vm169_vm1, %v296_v39, 0.0 }
  0xb8   :  { %301 = vadd.xlane.f32.xlu0 %v300_v40 }
 0x123   :  { %v299_v41 = vpop.xlane.xlu0 %298 }
 0x124   :  { %v310_v46 = vadd.f32 %v308_v43, %v299_v41 }
 0x126   :  { %v323_v51 = vperm.slane %v310_v46, %v322_v45 }
 0x12b   :  { %v302_v47 = vpop.xlane.xlu0 %301 }
 0x12c   :  { %v311_v48 = vadd.f32 %v308_v43, %v302_v47  ;;  %v276_v49 = vpop.f32.mrf.mxu3 }
 0x12d   :  { %v277_v50 = vadd.f32 %v483_v44, %v276_v49 }
 0x12e   :  { %v324_v52 = vperm.slane %v311_v48, %v322_v45 }
 0x12f   :  { %v289_v53 = vadd.f32 %v277_v50, %v216_v22 }
 0x130   :  { %v326_v54 = vsel %vm325_vm2, %v324_v52, %v323_v51 }
 0x131   :  { %v290_v55 = vmax.f32 %v289_v53, 0.0  ;;  %v329_v56 = vsel %vm328_vm3, %v326_v54, -inf }
 0x132   :  { %330 = vmax.xlane.f32.xlu2 %v329_v56 }
 0x133   :  { %v312_v57 = vmul.f32 %v481_v30, %v290_v55 }
 0x135   :  { %v314_v58 = vsel %vm313_vm4, %v312_v57, 0.0 }
 0x136   :  { %315 = vadd.xlane.f32.xlu1 %v314_v58 }
 0x1a5   :  { %v331_v61 = vpop.xlane.xlu2 %330 }
 0x1a9   :  { %v316_v59 = vpop.xlane.xlu1 %315 }
 0x1aa   :  { %v318_v60 = vadd.f32 %v482_v16, %v316_v59 }
 0x1ac   :  { %v332_v62 = vmax.f32 %v331_v61, %v318_v60 }
 0x1ae   :  { %v347_v63 = vsub.f32 %v318_v60, %v332_v62  ;;  %335 = vperm.xlu2 %476, %v332_v62  }
 0x1b0   :  { %v348_v15 = vmul.f32 1.442695, %v347_v63 }
 0x208   :  { %v336_v0 = vpop.permute.xlu2 %335 }
 0x209   :  { %v337_v1 = vperm.slane %v336_v0, 0  ;;  %v338_v2 = vperm.slane %v336_v0, 1 }
 0x20b   :  { %v341_v3 = vsub.f32 %v310_v46, %v337_v1  ;;  %v342_v4 = vsub.f32 %v311_v48, %v338_v2 }
 0x20d   :  { %v343_v5 = vmul.f32 1.442695, %v341_v3  ;;  %v345_v6 = vmul.f32 1.442695, %v342_v4 }
 0x20f   :  { %484 = vpow2.f32 %v343_v5 }
 0x210   :  { %486 = vpow2.f32 %v345_v6 }
 0x211   :  { %488 = vpow2.f32 %v348_v15 }
 0x215   :  { %v485_v7 = vpop.eup %484 }
 0x216   :  { %v487_v8 = vpop.eup %486  ;;  %353 = vperm.xlu0 %477, %v485_v7  }
 0x217   :  { %356 = vperm.xlu2 %476, %v487_v8   ;;  %v489_v16 = vpop.eup %488 }
 0x271   :  { %v357_v9 = vpop.permute.xlu2 %356 }
 0x272   :  { %v359_v11 = vperm.slane %v357_v9, %v322_v45 }
 0x288   :  { %v354_v10 = vpop.permute.xlu0 %353 }
 0x289   :  { %v358_v12 = vperm.slane %v354_v10, %v322_v45 }
 0x28b   :  { %v360_v13 = vsel %vm325_vm2, %v359_v11, %v358_v12 }
 0x28c   :  { %v362_v14 = vsel %vm328_vm3, %v360_v13, 0.0 }
 0x28d   :  { %363 = vadd.xlane.f32.xlu2 %v362_v14 }
 0x300   :  { %v364_v17 = vpop.xlane.xlu2 %363 }
 0x301   :  { %v365_v18 = vadd.f32 %v489_v16, %v364_v17 }
 0x303   :  { %490 = vrcp.f32 %v365_v18 }
 0x309   :  { %v491_v19 = vpop.eup %490 }
 0x30a   :  { %369 = vperm.xlu1 %475, %v491_v19   ;;  %v377_v20 = vmul.f32 %v491_v19, %v489_v16 }
 0x37c   :  { %v370_v21 = vpop.permute.xlu1 %369 }
 0x37d   :  { %v372_v22 = vperm.slane %v370_v21, 1  ;;  %v371_v24 = vperm.slane %v370_v21, 0 }
 0x37f   :  { %v376_v23 = vmul.f32 %v487_v8, %v372_v22  ;;  %v375_v25 = vmul.f32 %v485_v7, %v371_v24 }
 0x381   :  { %387 = vperm.xlu0 %477, %v376_v23  }
 0x389   :  { %382 = vperm.xlu0 %477, %v375_v25  }
 0x391   :  { %408 = vperm.xlu0 %477, %v377_v20  }
 0x3f3   :  { %v388_v29 = vpop.permute.xlu0 %387 }
 0x3f4   :  { %v391_v30 = vmul.f32 %v388_v29, %v379_v28 }
 0x3f6   :  { %v399_v31 = vsel %vm169_vm1, %v391_v30, 0.0 }
 0x3f7   :  { %v400_v32 = vrot.slane %v399_v31, 4 }
 0x3f9   :  { %v401_v34 = vadd.f32 %v400_v32, %v399_v31 }
 0x3fb   :  { %v402_v35 = vrot.slane %v401_v34, 2  ;;  %v383_v36 = vpop.permute.xlu0 %382 }
 0x3fc   :  { %v390_v37 = vmul.f32 %v383_v36, %v378_v33 }
 0x3fd   :  { %v403_v38 = vadd.f32 %v402_v35, %v401_v34 }
 0x3fe   :  { %v392_v39 = vsel %vm169_vm1, %v390_v37, 0.0 }
 0x3ff   :  { %v393_v40 = vrot.slane %v392_v39, 4  ;;  %v404_v42 = vrot.slane %v403_v38, 1 }
 0x401   :  { %v394_v41 = vadd.f32 %v393_v40, %v392_v39  ;;  %v405_v47 = vadd.f32 %v404_v42, %v403_v38 }
 0x403   :  { %v395_v43 = vrot.slane %v394_v41, 2  ;;  %v409_v44 = vpop.permute.xlu0 %408 }
 0x404   :  { %v411_v45 = vmul.f32 %v409_v44, %v796_v27 }
 0x405   :  { %v396_v46 = vadd.f32 %v395_v43, %v394_v41 }
 0x406   :  { %v413_v48 = vrot.slane %v411_v45, 1 }
 0x407   :  { %v397_v49 = vrot.slane %v396_v46, 1 }
 0x408   :  { %v417_v50 = vadd.f32 %v413_v48, %v405_v47 }
 0x409   :  { %v398_v51 = vadd.f32 %v397_v49, %v396_v46 }
 0x40a   :  { %v420_v52 = vrot.slane %v417_v50, 7 }
 0x40b   :  { %v416_v53 = vadd.f32 %v411_v45, %v398_v51 }
 0x40d   :  { %v421_v54 = vsel %vm325_vm2, %v420_v52, %v416_v53 }
 0x40e   :  { %423 = vst.msk [vmem:[#allocation14] sm:$0x3] %vm313_vm4, %v421_v54 }
 0x40f   :  { %434 = dma.vmem_to_hbm [thread:$0]  %s430_s11, 32, %s432_s27, [#allocation5]  }
 0x410   :  { %668 = dma.done.wait [#allocation5], 32  }
 0x411   :  { %669 = vsyncadd [#allocation5], 4294967264 }
 0x412   :  { %439 = vsyncpa [#allocation4], 1 }
 0x413   :  { %440 = vsyncpa [#allocation7], 1 }
 0x414   :  { %441 = vsyncpa [#allocation10], 1 }
 0x415   :  { %442 = vsyncpa [#allocation13], 1 }
 0x416   :  { %443 = vsyncpa [#allocation5], 1 }

</bundles_post_ra>
